<compile_context>
chip_gen: v6e
topology: v6e:2x2x1
jax: 0.10.0
libtpu: 0.0.40
codegen_flags: <defaults>
</compile_context>

<pallas_src>
import jax
import jax.numpy as jnp
from jax.experimental import pallas as pl
from jax.experimental.pallas import tpu as pltpu


# Per-block byte budget.  With double-buffered input + output (4 live blocks)
# this is 16 MiB of pipeline VMEM, comfortably under the 32 MiB limit we set
# below and under v7x's 64 MiB physical VMEM.
_BLOCK_BYTES = 4 * 1024 * 1024
_VMEM_LIMIT_BYTES = 32 * 1024 * 1024


def _chomp_copy_kernel(x_ref, o_ref):
    # In/out blocks are shape-identical, so this is a straight passthrough
    # (pure vreg move); all slicing lives in the grid / BlockSpec index maps.
    o_ref[...] = x_ref[...]


def _round_up(x: int, m: int) -> int:
    return ((x + m - 1) // m) * m


def chomp1d(x: jax.Array, chomp_size: int) -> jax.Array:
    """Pallas equivalent of PyTorch Chomp1d(chomp_size)(x) for x of shape (B, C, L).

    Note: requires 0 < chomp_size < L.  (PyTorch's degenerate x[:, :, :-0]
    would return an empty tensor; that case is intentionally rejected here.)
    """
    assert x.ndim == 3, "expected (batch, channels, length)"
    B, C, L = x.shape
    assert 0 < chomp_size < L, "chomp_size must be in (0, L)"
    out_len = L - chomp_size

    # Flatten (B, C) -> rows.  For a contiguous NCL tensor this reshape is a
    # free view; it lets us tile 2-D (rows x lanes) regardless of B / C.
    rows = B * C
    x2 = x.reshape(rows, L)

    itemsize = jnp.dtype(x.dtype).itemsize
    # Sublane packing granule: f32 -> 8, bf16 -> 16, int8/fp8 -> 32.
    sub = max(8, 32 // itemsize)

    # --- Byte-budget-driven tile sizing -----------------------------------
    # Lane tile: take the full (padded) out_len whenever it fits the budget at
    # minimum row height; otherwise the largest 128-multiple that fits.
    tl_full = _round_up(out_len, 128)
    max_tl = max(128, (_BLOCK_BYTES // (sub * itemsize)) // 128 * 128)
    TL = min(tl_full, max_tl)

    # Row tile: grow to fill the byte budget (this is what keeps blocks large
    # when out_len is short), capped at the padded row count.
    max_tr = max(sub, (_BLOCK_BYTES // (TL * itemsize)) // sub * sub)
    TR = min(_round_up(rows, sub), max_tr)

    grid_r = pl.cdiv(rows, TR)
    grid_l = pl.cdiv(out_len, TL)

    # --- Avoid a degenerate (1, 1) grid -----------------------------------
    # Split the row axis (preferred: keeps the output lane-dense) or, failing
    # that, the lane axis, so both TensorCores on v7x get work and read/write
    # DMAs overlap on all generations.
    if grid_r == 1 and grid_l == 1:
        rows_padded = _round_up(rows, sub)
        lanes_padded = _round_up(out_len, 128)
        if rows_padded >= 2 * sub:
            TR = _round_up(pl.cdiv(rows, 2), sub)
        elif lanes_padded >= 2 * 128:
            TL = _round_up(pl.cdiv(out_len, 2), 128)
        grid_r = pl.cdiv(rows, TR)
        grid_l = pl.cdiv(out_len, TL)

    grid = (grid_r, grid_l)

    # Pure memory traffic: read the kept prefix, write the kept prefix.
    bytes_accessed = 2 * rows * out_len * itemsize

    out2 = pl.pallas_call(
        _chomp_copy_kernel,
        out_shape=jax.ShapeDtypeStruct((rows, out_len), x.dtype),
        grid=grid,
        # Grid only walks out_len lane-tiles: the chomped tail of the input is
        # never DMA'd (beyond the clipped overhang of the single edge tile).
        in_specs=[pl.BlockSpec((TR, TL), lambda r, l: (r, l))],
        out_specs=pl.BlockSpec((TR, TL), lambda r, l: (r, l)),
        compiler_params=pltpu.CompilerParams(
            dimension_semantics=("parallel", "parallel"),
            vmem_limit_bytes=_VMEM_LIMIT_BYTES,
        ),
        cost_estimate=pl.CostEstimate(
            flops=0, transcendentals=0, bytes_accessed=bytes_accessed
        ),
    )(x2)

    return out2.reshape(B, C, out_len)


if __name__ == "__main__":
    # Chomp1d has no parameters; just deterministic inputs.
    key = jax.random.PRNGKey(0)

    # 1) Small shape consistent with the module's forward.
    B, C, L = 2, 4, 16
    chomp_size = 3
    x = jax.random.normal(key, (B, C, L), dtype=jnp.float32)

    y = chomp1d(x, chomp_size)
    jax.block_until_ready(y)

    ref = x[:, :, :-chomp_size]
    assert y.shape == (B, C, L - chomp_size), y.shape
    assert jnp.array_equal(y, ref), "mismatch vs reference slice (small case)"

    # 2) Multiple row tiles + masked edge lane tile.
    B2, C2, L2, chomp2 = 3, 5, 2300, 123
    x2 = jax.random.normal(jax.random.PRNGKey(0), (B2, C2, L2), dtype=jnp.float32)
    y2 = chomp1d(x2, chomp2)
    jax.block_until_ready(y2)

    ref2 = x2[:, :, :-chomp2]
    assert y2.shape == (B2, C2, L2 - chomp2), y2.shape
    assert jnp.array_equal(y2, ref2), "mismatch vs reference slice (tiled case)"

    # 3) Short out_len / many rows (typical TCN regime) in bf16: exercises the
    #    grown-TR path, the bf16 sublane granule, and the forced grid split.
    B3, C3, L3, chomp3 = 8, 64, 384, 128
    x3 = jax.random.normal(jax.random.PRNGKey(0), (B3, C3, L3), dtype=jnp.bfloat16)
    y3 = chomp1d(x3, chomp3)
    jax.block_until_ready(y3)

    ref3 = x3[:, :, :-chomp3]
    assert y3.shape == (B3, C3, L3 - chomp3), y3.shape
    assert jnp.array_equal(y3, ref3), "mismatch vs reference slice (bf16 short-seq case)"

    print("KERNEL_OK")
</pallas_src>

<mosaic_0001>
module attributes {stable_mosaic.version = 11 : i64} {
  func.func @_chomp_copy_kernel(%arg0: i32, %arg1: i32, %arg2: memref<8x128xf32, #tpu.memory_space<vmem>>, %arg3: memref<8x128xf32, #tpu.memory_space<vmem>>) attributes {dimension_semantics = [#tpu.dimension_semantics<parallel>, #tpu.dimension_semantics<parallel>], iteration_bounds = array<i64: 1, 1>, scalar_prefetch = 0 : i64, scratch_operands = 0 : i64, tpu.core_type = #tpu.core_type<tc>, window_params = [{transform_indices = @transform_0, window_bounds = array<i64: 8, 128>}, {transform_indices = @transform_1, window_bounds = array<i64: 8, 128>}]} {
    %c0 = arith.constant 0 : index
    %c0_0 = arith.constant 0 : index
    %0 = vector.load %arg2[%c0, %c0_0] : memref<8x128xf32, #tpu.memory_space<vmem>>, vector<8x128xf32>
    %c0_1 = arith.constant 0 : index
    %c0_2 = arith.constant 0 : index
    %1 = vector.load %arg3[%c0_1, %c0_2] : memref<8x128xf32, #tpu.memory_space<vmem>>, vector<8x128xf32>
    tpu.vector_store %arg3[%c0_1, %c0_2], %0 {strides = array<i32>} : memref<8x128xf32, #tpu.memory_space<vmem>>, vector<8x128xf32>,
    return
  }
  func.func @transform_0(%arg0: i32, %arg1: i32) -> (i32, i32) {
    %c0_i32 = arith.constant 0 : i32
    return %arg0, %arg1 : i32, i32
  }
  func.func @transform_1(%arg0: i32, %arg1: i32) -> (i32, i32) {
    %c0_i32 = arith.constant 0 : i32
    return %arg0, %arg1 : i32, i32
  }
}

</mosaic_0001>

<bundles_post_ra>
// kernel: tpu_custom_call.1
= control target key start
LH: loop header
LB: loop body
LE: loop exit
PB: predicated region body
PF: predicated region fallthrough
CT: control target
= control target key end

     0   :  { %6 = vsyncpa [#allocation3], 0  ;;  %s102_s0 = inlined_call_operand.hbm [shape: f32[8,16], index: 0, kind: input, shape index: {}]   ;;  %s103_s1 = inlined_call_operand.hbm [shape: f32[8,13], index: 1, kind: output, shape index: {}]  }
   0x1   :  { %7 = vsyncpa [#allocation4], 0  ;;  %s84_s6 = smov [#allocation2]  }
   0x2   :  { %s14_s7 = sshll.u32 %s84_s6, 4  ;;  %s15_s7 = int_to_ptr.vmem [resolvable:$true] %s14_s7 }
   0x3   :  { %s48_s8 = scalar_lea.vmem %s15_s7, 128  ;;  %p53_p1 = scmp.lt.s32.totalorder %s15_s7, %s15_s7 }
   0x4   :  { %p49_p0 = scmp.ne.s32.totalorder %s15_s7, %s48_s8  ;;  %p54_p2 = scmp.lt.s32.totalorder %s48_s8, %s48_s8 }
   0x6   :  { %p55_p3 = por %p54_p2, %p53_p1 }
   0x8   :  { %p56_p4 = pnand %p55_p3, %p49_p0 }
   0xa   :  { %59 = shalt.err (!%p56_p4)
}
   0xb   :  { %17 = dma.hbm_to_vmem [thread:$0]  %s102_s0, 128, %s15_s7, [#allocation3]  }
   0xc   :  { %80 = dma.done.wait [#allocation3], 128  }
   0xd   :  { %81 = vsyncadd [#allocation3], 4294967168  ;;  %s85_s11 = smov [#allocation5]   ;;  %v21_v0 = vld [vmem:[#allocation2] sm:$0xff] }
   0xe   :  { %s29_s12 = sshll.u32 %s85_s11, 4  ;;  %22 = vst [vmem:[#allocation5] sm:$0xff] %v21_v0  ;;  %s30_s12 = int_to_ptr.vmem [resolvable:$true] %s29_s12 }
   0xf   :  { %s60_s13 = scalar_lea.vmem %s30_s12, 128  ;;  %p65_p6 = scmp.lt.s32.totalorder %s30_s12, %s30_s12 }
  0x10   :  { %p61_p5 = scmp.ne.s32.totalorder %s30_s12, %s60_s13  ;;  %p66_p7 = scmp.lt.s32.totalorder %s60_s13, %s60_s13 }
  0x12   :  { %p67_p8 = por %p66_p7, %p65_p6 }
  0x14   :  { %p68_p9 = pnand %p67_p8, %p61_p5 }
  0x16   :  { %71 = shalt.err (!%p68_p9)
}
  0x17   :  { %32 = dma.vmem_to_hbm [thread:$0]  %s30_s12, 128, %s103_s1, [#allocation4]  }
  0x18   :  { %82 = dma.done.wait [#allocation4], 128  }
  0x19   :  { %83 = vsyncadd [#allocation4], 4294967168 }
  0x1a   :  { %36 = vsyncpa [#allocation3], 1 }
  0x1b   :  { %37 = vsyncpa [#allocation4], 1 }

</bundles_post_ra>
